<compile_context>
chip_gen: v5e
topology: v5e:2x2
jax: 0.10.0
libtpu: 0.0.40
codegen_flags: <defaults>
</compile_context>

<pallas_src>
import functools

import jax
import jax.numpy as jnp
from jax.experimental import pallas as pl
from jax.experimental.pallas import tpu as pltpu


def _round_up(x: int, m: int) -> int:
    return (x + m - 1) // m * m


# ----------------------------- Pallas kernel --------------------------------

def _spiking_dense_kernel(tj_ref, w_ref, bias_ref, out_ref, *, t_max, output_layer):
    """Pure-MXU matmul with fused SpikingDense epilogue.

    Grid is (M/tm, N/tn, K/tk), K innermost. The output block index ignores k,
    so out_ref is VMEM-resident across the K loop and serves as the float32
    accumulator directly (no scratch buffer, no epilogue tile copy).
    """
    k = pl.program_id(2)

    @pl.when(k == 0)
    def _init():
        out_ref[...] = jnp.zeros_like(out_ref)

    # acc += tj @ W   (operands stay in their native dtype, f32 accumulation).
    out_ref[...] += jnp.dot(tj_ref[...], w_ref[...],
                            preferred_element_type=jnp.float32)

    @pl.when(k == pl.num_programs(2) - 1)
    def _epilogue():
        acc = out_ref[...]
        bias = bias_ref[...]                  # (1, tn) f32, broadcasts over rows
        if output_layer:
            # out = alpha*dt + (t_min - tj) @ W  ==  bias - tj @ W
            out_ref[...] = bias - acc
        else:
            # ti = (tj - t_min) @ W + (t_max - D_i)  ==  tj @ W + bias, clamp t_max.
            # NOTE: jnp.minimum differs from the torch.where reference only when
            # ti is NaN (minimum propagates NaN); harmless for real inputs.
            out_ref[...] = jnp.minimum(acc + bias, t_max)


# ----------------------- per-layer parameter preparation ---------------------

def prepare_spiking_dense_params(W, D_i, *, t_min_prev, t_min, t_max,
                                 output_layer=False, compute_dtype=None):
    """One-off padding + bias folding (hoist out of the per-call hot path).

    W  : [input_dim, units]    D_i: [units]
    Returns a dict of padded device arrays + static tiling metadata.
    """
    input_dim, units = W.shape
    t_min_prev = float(t_min_prev)
    t_min = float(t_min)
    t_max = float(t_max)

    in_dtype = (jnp.dtype(compute_dtype) if compute_dtype is not None
                else jnp.dtype(W.dtype))

    # N / K tiling (batch independent). 512-wide output tiles / 2048-deep K keep
    # arithmetic intensity above the HBM ridge while fitting v7x's 64 MiB VMEM.
    tn = min(512, _round_up(units, 128))
    tk = min(2048, _round_up(input_dim, 128))
    n_pad = _round_up(units, tn)
    k_pad = _round_up(input_dim, tk)

    # Weights in MXU compute dtype. Padded K rows MUST stay exactly zero so the
    # padded region of tj @ W contributes 0 (padded M rows / N cols are sliced
    # off after the kernel).
    w_c = W.astype(in_dtype)
    w_p = jnp.zeros((k_pad, n_pad), in_dtype).at[:input_dim, :units].set(w_c)

    # Fold all scalar algebra (including the `- t_min` input shift) into a
    # single per-unit f32 bias. colsum uses the same W values the MXU sees.
    colsum = jnp.sum(w_c.astype(jnp.float32), axis=0)        # (units,)
    d = D_i.astype(jnp.float32)
    if output_layer:
        dt = t_min - t_min_prev
        bias = (d / (dt + 1e-10)) * dt + t_min * colsum      # alpha*dt + t_min*colsum
    else:
        bias = (t_max - d) - t_min * colsum                  # (t_max - D_i) - t_min*colsum
    bias_p = jnp.zeros((1, n_pad), jnp.float32).at[0, :units].set(bias)

    return dict(
        w_p=w_p, bias_p=bias_p,
        units=units, input_dim=input_dim,
        tn=tn, tk=tk, n_pad=n_pad, k_pad=k_pad,
        t_max=t_max, output_layer=bool(output_layer), in_dtype=in_dtype,
    )


# ------------------------------ per-call apply --------------------------------

def spiking_dense_apply(tj, params):
    """Run the SpikingDense forward for one batch of spike times tj: [batch, input_dim]."""
    batch, input_dim = tj.shape
    assert input_dim == params["input_dim"], "tj feature dim must match W"

    in_dtype = params["in_dtype"]
    itemsize = jnp.dtype(in_dtype).itemsize
    units = params["units"]
    n_pad, k_pad = params["n_pad"], params["k_pad"]
    tn, tk = params["tn"], params["tk"]
    t_max, output_layer = params["t_max"], params["output_layer"]

    # M tile rounded to the packed sublane multiple of the compute dtype.
    m_align = {4: 8, 2: 16, 1: 32}.get(itemsize, 8)
    tm = min(512, _round_up(batch, m_align))
    m_pad = _round_up(batch, tm)

    # v7x megacore: ensure >=2 tiles along a "parallel" axis when the problem
    # allows, so the second TensorCore is not idle on small layers.
    if (m_pad // tm) * (n_pad // tn) == 1:
        if tn >= 256 and tn % 256 == 0:
            tn = tn // 2                       # still a 128-multiple dividing n_pad
        elif batch > m_align:
            tm = _round_up(pl.cdiv(batch, 2), m_align)
            m_pad = _round_up(batch, tm)

    # Only tj is padded per call (K region zero-padded; W was padded once).
    tj_p = jnp.zeros((m_pad, k_pad), in_dtype).at[:batch, :input_dim].set(
        tj.astype(in_dtype))

    grid = (m_pad // tm, n_pad // tn, k_pad // tk)

    # VMEM budget: double-buffered tj/W input tiles + the f32 output tile
    # (doubles as accumulator) + the bias tile; cap at ~75% of physical VMEM.
    vmem_needed = (2 * (tm * tk + tk * tn) * itemsize
                   + 2 * tm * tn * 4
                   + 2 * tn * 4)
    try:
        vmem_cap = int(pltpu.get_tpu_info().vmem_capacity_bytes)
    except Exception:  # pragma: no cover - conservative fallback
        vmem_cap = 64 * 1024 * 1024
    vmem_limit = int(min(0.75 * vmem_cap, max(2 * vmem_needed, 32 * 1024 * 1024)))
    vmem_limit = int(min(0.75 * vmem_cap, max(vmem_limit, vmem_needed + (1 << 20))))

    # Re-streaming-aware byte count (tj re-read per N tile, W per M tile).
    cost = pl.CostEstimate(
        flops=2 * m_pad * n_pad * k_pad,
        transcendentals=0,
        bytes_accessed=((m_pad * k_pad * (n_pad // tn)
                         + k_pad * n_pad * (m_pad // tm)) * itemsize
                        + n_pad * 4 * (m_pad // tm)
                        + m_pad * n_pad * 4),
    )

    kernel = functools.partial(
        _spiking_dense_kernel, t_max=t_max, output_layer=output_layer)

    out_p = pl.pallas_call(
        kernel,
        out_shape=jax.ShapeDtypeStruct((m_pad, n_pad), jnp.float32),
        grid_spec=pltpu.PrefetchScalarGridSpec(
            num_scalar_prefetch=0,
            grid=grid,
            in_specs=[
                pl.BlockSpec((tm, tk), lambda i, j, k: (i, k)),   # tj tile
                pl.BlockSpec((tk, tn), lambda i, j, k: (k, j)),   # W tile
                pl.BlockSpec((1, tn), lambda i, j, k: (0, j)),    # bias (N only)
            ],
            out_specs=pl.BlockSpec((tm, tn), lambda i, j, k: (i, j)),
        ),
        compiler_params=pltpu.CompilerParams(
            dimension_semantics=("parallel", "parallel", "arbitrary"),
            vmem_limit_bytes=vmem_limit,
        ),
        cost_estimate=cost,
    )(tj_p, params["w_p"], params["bias_p"])

    return out_p[:batch, :units]


def spiking_dense_forward(tj, W, D_i, *, t_min_prev, t_min, t_max,
                          output_layer=False, compute_dtype=None):
    """Convenience wrapper: prepare (pad/fold) + apply in one call."""
    params = prepare_spiking_dense_params(
        W, D_i, t_min_prev=t_min_prev, t_min=t_min, t_max=t_max,
        output_layer=output_layer, compute_dtype=compute_dtype)
    return spiking_dense_apply(tj, params)


# ------------------------- reference (plain JAX) -----------------------------

def spiking_dense_ref(tj, W, D_i, *, t_min_prev, t_min, t_max, output_layer=False):
    tj = tj.astype(jnp.float32)
    W = W.astype(jnp.float32)
    D_i = D_i.astype(jnp.float32)
    if not output_layer:
        threshold = t_max - t_min - D_i
        ti = jnp.matmul(tj - t_min, W) + threshold + t_min
        return jnp.where(ti < t_max, ti, t_max)
    else:
        w_mult_x = jnp.matmul(t_min - tj, W)
        alpha = D_i / (t_min - t_min_prev + 1e-10)
        return alpha * (t_min - t_min_prev) + w_mult_x


# ---------------------------------- main -------------------------------------

if __name__ == "__main__":
    key = jax.random.PRNGKey(0)
    k_tj, k_w, k_d, k_tj2, k_w2 = jax.random.split(key, 5)

    # set_params(t_min_prev=0.0, t_min=1.0): t_max = t_min + B_n (B_n = 1.5)
    t_min_prev, t_min = 0.0, 1.0
    t_max = t_min + 1.5

    # ---- Case 1 & 2: small module-consistent shapes, hidden + output paths ---
    batch, input_dim, units = 8, 32, 16
    limit = (6.0 / (input_dim + units)) ** 0.5       # glorot_uniform as in __init__
    W = jax.random.uniform(k_w, (input_dim, units), jnp.float32, -limit, limit)
    D_i = jnp.zeros((units,), jnp.float32)           # nn.Parameter(torch.zeros(units))
    tj = jax.random.uniform(k_tj, (batch, input_dim), jnp.float32, t_min_prev, t_min)

    out_hidden = spiking_dense_forward(
        tj, W, D_i, t_min_prev=t_min_prev, t_min=t_min, t_max=t_max,
        output_layer=False)
    jax.block_until_ready(out_hidden)
    ref_hidden = spiking_dense_ref(
        tj, W, D_i, t_min_prev=t_min_prev, t_min=t_min, t_max=t_max,
        output_layer=False)
    assert jnp.allclose(out_hidden, ref_hidden, atol=1e-5, rtol=1e-5)

    D_i_out = jax.random.normal(k_d, (units,), jnp.float32) * 0.1
    out_final = spiking_dense_forward(
        tj, W, D_i_out, t_min_prev=t_min_prev, t_min=t_min, t_max=t_max,
        output_layer=True)
    jax.block_until_ready(out_final)
    ref_final = spiking_dense_ref(
        tj, W, D_i_out, t_min_prev=t_min_prev, t_min=t_min, t_max=t_max,
        output_layer=True)
    assert jnp.allclose(out_final, ref_final, atol=1e-5, rtol=1e-5)

    # ---- Case 3: exercises K padding, N split (megacore), and the epilogue ---
    batch2, input_dim2, units2 = 16, 640, 130
    limit2 = (6.0 / (input_dim2 + units2)) ** 0.5
    W2 = jax.random.uniform(k_w2, (input_dim2, units2), jnp.float32, -limit2, limit2)
    D_i2 = jnp.zeros((units2,), jnp.float32)
    tj2 = jax.random.uniform(k_tj2, (batch2, input_dim2), jnp.float32,
                             t_min_prev, t_min)

    params_big = prepare_spiking_dense_params(       # padding hoisted (per-layer)
        W2, D_i2, t_min_prev=t_min_prev, t_min=t_min, t_max=t_max,
        output_layer=False)
    out_big = spiking_dense_apply(tj2, params_big)
    jax.block_until_ready(out_big)
    ref_big = spiking_dense_ref(
        tj2, W2, D_i2, t_min_prev=t_min_prev, t_min=t_min, t_max=t_max,
        output_layer=False)
    assert jnp.allclose(out_big, ref_big, atol=1e-4, rtol=1e-5)

    # ---- Case 4: bf16 MXU path (f32 accumulation), wider tolerance -----------
    out_bf16 = spiking_dense_forward(
        tj, W, D_i, t_min_prev=t_min_prev, t_min=t_min, t_max=t_max,
        output_layer=False, compute_dtype=jnp.bfloat16)
    jax.block_until_ready(out_bf16)
    assert jnp.allclose(out_bf16, ref_hidden, atol=5e-2, rtol=5e-2)

    print("KERNEL_OK")
</pallas_src>

<mosaic_0001>
module attributes {stable_mosaic.version = 11 : i64} {
  func.func @_spiking_dense_kernel(%arg0: i32, %arg1: i32, %arg2: i32, %arg3: memref<8x128xf32, #tpu.memory_space<vmem>>, %arg4: memref<128x128xf32, #tpu.memory_space<vmem>>, %arg5: memref<1x128xf32, #tpu.memory_space<vmem>>, %arg6: memref<8x128xf32, #tpu.memory_space<vmem>>) attributes {dimension_semantics = [#tpu.dimension_semantics<parallel>, #tpu.dimension_semantics<parallel>, #tpu.dimension_semantics<arbitrary>], iteration_bounds = array<i64: 1, 1, 1>, scalar_prefetch = 0 : i64, scratch_operands = 0 : i64, tpu.core_type = #tpu.core_type<tc>, window_params = [{transform_indices = @transform_0, window_bounds = array<i64: 8, 128>}, {transform_indices = @transform_1, window_bounds = array<i64: 128, 128>}, {transform_indices = @transform_2, window_bounds = array<i64: 1, 128>}, {transform_indices = @transform_3, window_bounds = array<i64: 8, 128>}]} {
    %c0_i32 = arith.constant 0 : i32
    %0 = arith.cmpi eq, %arg2, %c0_i32 : i32
    %1 = arith.extui %0 : i1 to i32
    %c0_i32_0 = arith.constant 0 : i32
    %2 = arith.cmpi ne, %1, %c0_i32_0 : i32
    scf.if %2 {
      %cst_10 = arith.constant 0.000000e+00 : f32
      %12 = vector.broadcast %cst_10 : f32 to vector<8x128xf32>
      %c0_11 = arith.constant 0 : index
      %c0_12 = arith.constant 0 : index
      %13 = vector.load %arg6[%c0_11, %c0_12] : memref<8x128xf32, #tpu.memory_space<vmem>>, vector<8x128xf32>
      tpu.vector_store %arg6[%c0_11, %c0_12], %12 {strides = array<i32>} : memref<8x128xf32, #tpu.memory_space<vmem>>, vector<8x128xf32>,
    } else {
    }
    %c0 = arith.constant 0 : index
    %c0_1 = arith.constant 0 : index
    %3 = vector.load %arg6[%c0, %c0_1] : memref<8x128xf32, #tpu.memory_space<vmem>>, vector<8x128xf32>
    %c0_2 = arith.constant 0 : index
    %c0_3 = arith.constant 0 : index
    %4 = vector.load %arg3[%c0_2, %c0_3] : memref<8x128xf32, #tpu.memory_space<vmem>>, vector<8x128xf32>
    %c0_4 = arith.constant 0 : index
    %c0_5 = arith.constant 0 : index
    %5 = vector.load %arg4[%c0_4, %c0_5] : memref<128x128xf32, #tpu.memory_space<vmem>>, vector<128x128xf32>
    %cst = arith.constant dense<0.000000e+00> : vector<8x128xf32>
    %6 = tpu.matmul %4, %5, %cst {dimension_numbers = #tpu.dot_dimension_numbers<[1], [0], [0], [1], [0, 0, 1, 1], [], []>} : vector<8x128xf32>, vector<128x128xf32>, vector<8x128xf32> -> vector<8x128xf32>
    %7 = arith.addf %3, %6 : vector<8x128xf32>
    %c0_6 = arith.constant 0 : index
    %c0_7 = arith.constant 0 : index
    %8 = vector.load %arg6[%c0_6, %c0_7] : memref<8x128xf32, #tpu.memory_space<vmem>>, vector<8x128xf32>
    tpu.vector_store %arg6[%c0_6, %c0_7], %7 {strides = array<i32>} : memref<8x128xf32, #tpu.memory_space<vmem>>, vector<8x128xf32>,
    %c0_i32_8 = arith.constant 0 : i32
    %9 = arith.cmpi eq, %arg2, %c0_i32_8 : i32
    %10 = arith.extui %9 : i1 to i32
    %c0_i32_9 = arith.constant 0 : i32
    %11 = arith.cmpi ne, %10, %c0_i32_9 : i32
    scf.if %11 {
      %c0_10 = arith.constant 0 : index
      %c0_11 = arith.constant 0 : index
      %12 = vector.load %arg6[%c0_10, %c0_11] : memref<8x128xf32, #tpu.memory_space<vmem>>, vector<8x128xf32>
      %c0_12 = arith.constant 0 : index
      %c0_13 = arith.constant 0 : index
      %13 = vector.load %arg5[%c0_12, %c0_13] : memref<1x128xf32, #tpu.memory_space<vmem>>, vector<1x128xf32>
      %14 = vector.broadcast %13 : vector<1x128xf32> to vector<8x128xf32>
      %15 = arith.addf %12, %14 : vector<8x128xf32>
      %cst_14 = arith.constant 2.500000e+00 : f32
      %16 = vector.broadcast %cst_14 : f32 to vector<8x128xf32>
      %17 = arith.minimumf %15, %16 : vector<8x128xf32>
      %c0_15 = arith.constant 0 : index
      %c0_16 = arith.constant 0 : index
      %18 = vector.load %arg6[%c0_15, %c0_16] : memref<8x128xf32, #tpu.memory_space<vmem>>, vector<8x128xf32>
      tpu.vector_store %arg6[%c0_15, %c0_16], %17 {strides = array<i32>} : memref<8x128xf32, #tpu.memory_space<vmem>>, vector<8x128xf32>,
    } else {
    }
    return
  }
  func.func @transform_0(%arg0: i32, %arg1: i32, %arg2: i32) -> (i32, i32) {
    %c0_i32 = arith.constant 0 : i32
    return %arg0, %arg2 : i32, i32
  }
  func.func @transform_1(%arg0: i32, %arg1: i32, %arg2: i32) -> (i32, i32) {
    %c0_i32 = arith.constant 0 : i32
    return %arg2, %arg1 : i32, i32
  }
  func.func @transform_2(%arg0: i32, %arg1: i32, %arg2: i32) -> (i32, i32) {
    %c0_i32 = arith.constant 0 : i32
    %c0_i32_0 = arith.constant 0 : i32
    return %c0_i32, %arg1 : i32, i32
  }
  func.func @transform_3(%arg0: i32, %arg1: i32, %arg2: i32) -> (i32, i32) {
    %c0_i32 = arith.constant 0 : i32
    return %arg0, %arg1 : i32, i32
  }
}

</mosaic_0001>

<bundles_post_ra>
// kernel: tpu_custom_call.1
= control target key start
LH: loop header
LB: loop body
LE: loop exit
PB: predicated region body
PF: predicated region fallthrough
CT: control target
= control target key end

     0   :  { %8 = vsyncpa [#allocation3], 0  ;;  %s241_s0 = inlined_call_operand.hbm [shape: f32[8,128], index: 0, kind: input, shape index: {}]   ;;  %s242_s1 = inlined_call_operand.hbm [shape: f32[128,128], index: 1, kind: input, shape index: {}]   ;;  %s243_s2 = inlined_call_operand.vmem [shape: f32[1,128], index: 2, kind: input, shape index: {}]   ;;  %s244_s3 = inlined_call_operand.hbm [shape: f32[8,128], index: 3, kind: output, shape index: {}]  }
   0x1   :  { %9 = vsyncpa [#allocation6], 0 }
   0x2   :  { %10 = vsyncpa [#allocation4], 0  ;;  %s16_s14 = sshll.u32 %s241_s0, 4  ;;  %s204_s15 = smov [#allocation2]   ;;  %s17_s14 = int_to_ptr.hbm [resolvable:$true] %s16_s14 }
   0x3   :  { %s18_s16 = sshll.u32 %s204_s15, 4  ;;  %s26_s19 = sshll.u32 %s242_s1, 4  ;;  %s19_s16 = int_to_ptr.vmem [resolvable:$true] %s18_s16  ;;  %s27_s19 = int_to_ptr.hbm [resolvable:$true] %s26_s19 }
   0x4   :  { %21 = dma.hbm_to_vmem [thread:$0]  %s17_s14, 128, %s19_s16, [#allocation3]  }
   0x5   :  { %s205_s20 = smov [#allocation5]   ;;  %s206_s22 = smov 128  }
   0x6   :  { %s28_s21 = sshll.u32 %s205_s20, 4  ;;  %s207_s23 = smov 8   ;;  %s29_s21 = int_to_ptr.vmem [resolvable:$true] %s28_s21 }
   0x7   :  { %34 = dma.hbm_to_vmem [thread:$0]  %s27_s19, 2048, %s29_s21, [#allocation6], %s206_s22, %s206_s22, %s207_s23  }
   0x8   :  { %198 = dma.done.wait [#allocation3], 128  }
   0x9   :  { %199 = vsyncadd [#allocation3], 4294967168 }
   0xa   :  { %200 = dma.done.wait [#allocation6], 2048  }
   0xb   :  { %201 = vsyncadd [#allocation6], 4294965248  ;;  %v67_v0 = vld [vmem:[#allocation5 + $0x78] sm:$0xff]  ;;  %v66_v1 = vld [vmem:[#allocation5 + $0x70] sm:$0xff]  ;;  %s208_s24 = smov [#allocation7]   ;;  %s108_s28 = sshll.u32 %s244_s3, 4  ;;  %s109_s28 = int_to_ptr.hbm [resolvable:$true] %s108_s28 }
   0xc   :  { %68 = vmatpush.msra.mxu0 %v67_v0  ;;  %v65_v2 = vld [vmem:[#allocation5 + $0x68] sm:$0xff]  ;;  %v64_v3 = vld [vmem:[#allocation5 + $0x60] sm:$0xff]  ;;  %v63_v4 = vld [vmem:[#allocation5 + $0x58] sm:$0xff]  ;;  %s106_s25 = sshll.u32 %s208_s24, 4  ;;  %s107_s25 = int_to_ptr.vmem [resolvable:$true] %s106_s25 }
   0xd   :  { %v62_v5 = vld [vmem:[#allocation5 + $0x50] sm:$0xff]  ;;  %v61_v6 = vld [vmem:[#allocation5 + $0x48] sm:$0xff]  ;;  %v60_v7 = vld [vmem:[#allocation5 + $0x40] sm:$0xff] }
   0xe   :  { %69 = vmatpush.msra.mxu0 %v66_v1  ;;  %v59_v8 = vld [vmem:[#allocation5 + $0x38] sm:$0xff]  ;;  %v58_v9 = vld [vmem:[#allocation5 + $0x30] sm:$0xff]  ;;  %v57_v10 = vld [vmem:[#allocation5 + $0x28] sm:$0xff] }
   0xf   :  { %v56_v11 = vld [vmem:[#allocation5 + $0x20] sm:$0xff]  ;;  %v55_v12 = vld [vmem:[#allocation5 + $0x18] sm:$0xff]  ;;  %v54_v13 = vld [vmem:[#allocation5 + $0x10] sm:$0xff] }
  0x10   :  { %70 = vmatpush.msra.mxu0 %v65_v2  ;;  %v53_v14 = vld [vmem:[#allocation5 + $0x8] sm:$0xff]  ;;  %v52_v15 = vld [vmem:[#allocation5] sm:$0xff]  ;;  %v51_v16 = vld [vmem:[#allocation2] sm:$0xff] }
  0x11   :  { %v125_v17 = vld [vmem:[%s243_s2] ss:$0 sm:$0xff] }
  0x12   :  { %71 = vmatpush.msra.mxu0 %v64_v3 }
  0x14   :  { %72 = vmatpush.msra.mxu0 %v63_v4 }
  0x16   :  { %73 = vmatpush.msra.mxu0 %v62_v5 }
  0x18   :  { %74 = vmatpush.msra.mxu0 %v61_v6 }
  0x1a   :  { %75 = vmatpush.msra.mxu0 %v60_v7 }
  0x1c   :  { %76 = vmatpush.msra.mxu0 %v59_v8 }
  0x1e   :  { %77 = vmatpush.msra.mxu0 %v58_v9 }
  0x20   :  { %78 = vmatpush.msra.mxu0 %v57_v10 }
  0x22   :  { %79 = vmatpush.msra.mxu0 %v56_v11 }
  0x24   :  { %80 = vmatpush.msra.mxu0 %v55_v12 }
  0x26   :  { %81 = vmatpush.msra.mxu0 %v54_v13 }
  0x28   :  { %82 = vmatpush.msra.mxu0 %v53_v14 }
  0x2a   :  { %83 = vmatpush.msra.mxu0 %v52_v15 }
  0x2b   :  { %84 = vmatmul.f32.vlgmr.msra.gmra.mxu0 %v51_v16 }
  0xa8   :  { %v85_v18 = vpop.f32.mrf.mxu0 }
  0xa9   :  { %v98_v19 = vadd.f32 %v125_v17, %v85_v18 }
  0xab   :  { %v99_v20 = vmin.f32 %v98_v19, 2.5 }
  0xad   :  { %100 = vst [vmem:[#allocation7] sm:$0xff] %v99_v20 }
  0xae   :  { %111 = dma.vmem_to_hbm [thread:$0]  %s107_s25, 128, %s109_s28, [#allocation4]  }
  0xaf   :  { %202 = dma.done.wait [#allocation4], 128  }
  0xb0   :  { %203 = vsyncadd [#allocation4], 4294967168 }
  0xb1   :  { %116 = vsyncpa [#allocation3], 1 }
  0xb2   :  { %117 = vsyncpa [#allocation6], 1 }
  0xb3   :  { %118 = vsyncpa [#allocation4], 1 }

</bundles_post_ra>
